<compile_context>
chip_gen: v6e
topology: v6e:2x2x1
jax: 0.10.0
libtpu: 0.0.40
codegen_flags: <defaults>
</compile_context>

<pallas_src>
import jax
import jax.numpy as jnp
from jax.experimental import pallas as pl
from jax.experimental.pallas import tpu as pltpu

IN_SIZE = 28 * 28          # 784  (MNIST 28x28)
HID_SIZE = 128
OUT_SIZE = 10              # 10 MNIST classes

K_PAD = 896                # 784 padded up to 7 * 128 lanes
OUT_PAD = 128              # 10 classes padded up to one full 128-lane register
DEFAULT_TB = 256           # batch tile: multiple of 256 rows (v6e/v7x MXU), also /8


def _round_up(x, m):
    return ((x + m - 1) // m) * m


def mlp_kernel(x_ref, w1_ref, b1_ref, w2_ref, b2_ref, w3_ref, b3_ref, o_ref):
    # x tile: (TB, 896) bf16; weights bf16 (VMEM-resident); biases f32.
    x = x_ref[...]

    # features: Linear(896,128) -> ReLU -> Linear(128,128) -> ReLU  (MXU, f32 acc)
    h1 = jnp.dot(x, w1_ref[...], preferred_element_type=jnp.float32) + b1_ref[...]
    h1 = jnp.maximum(h1, 0.0).astype(jnp.bfloat16)
    h2 = jnp.dot(h1, w2_ref[...], preferred_element_type=jnp.float32) + b2_ref[...]
    h2 = jnp.maximum(h2, 0.0).astype(jnp.bfloat16)

    # out: Linear(128,128-padded); columns >= OUT_SIZE carry zero weights/bias.
    logits = jnp.dot(h2, w3_ref[...], preferred_element_type=jnp.float32) + b3_ref[...]

    # Mask the padded class columns so they do not contribute to the softmax.
    col = jax.lax.broadcasted_iota(jnp.int32, logits.shape, 1)
    logits = jnp.where(col < OUT_SIZE, logits, jnp.float32(-1e30))

    # numerically stable softmax over the (lane-dense) class dim
    m = jnp.max(logits, axis=-1, keepdims=True)
    e = jnp.exp(logits - m)
    denom = jnp.sum(e, axis=-1, keepdims=True)
    o_ref[...] = (e * pl.reciprocal(denom, approx=True)).astype(o_ref.dtype)


def prepare_params(params):
    """One-time conversion of PyTorch-style (out,in) params into kernel-ready,
    transposed / zero-padded / bf16 tensors.  Do NOT call per forward pass."""
    w1, b1, w2, b2, w3, b3 = params
    w1p = jnp.pad(w1.T, ((0, K_PAD - IN_SIZE), (0, 0))).astype(jnp.bfloat16)   # (896, 128)
    w2p = w2.T.astype(jnp.bfloat16)                                            # (128, 128)
    w3p = jnp.pad(w3.T, ((0, 0), (0, OUT_PAD - OUT_SIZE))).astype(jnp.bfloat16)  # (128, 128)
    b1r = b1.reshape(1, -1).astype(jnp.float32)                                # (1, 128)
    b2r = b2.reshape(1, -1).astype(jnp.float32)                                # (1, 128)
    b3r = jnp.pad(b3, (0, OUT_PAD - OUT_SIZE)).reshape(1, -1).astype(jnp.float32)  # (1, 128)
    return (w1p, b1r, w2p, b2r, w3p, b3r)


def mlp_classifier_forward(x_nchw, prepared_params, *, tb=DEFAULT_TB):
    """x_nchw: (B, 1, 28, 28).  Returns (B, 10) softmax probabilities (f32)."""
    B = x_nchw.shape[0]
    x = x_nchw.reshape(B, -1).astype(jnp.bfloat16)                 # (B, 784), bf16 stream

    # Tile the batch; clamp tile for tiny batches (must stay a multiple of 8 sublanes).
    tb = min(tb, _round_up(B, 8))
    Bp = _round_up(B, tb)
    x = jnp.pad(x, ((0, Bp - B), (0, K_PAD - IN_SIZE)))            # (Bp, 896), zero pads
    n_tiles = Bp // tb

    w1p, b1r, w2p, b2r, w3p, b3r = prepared_params

    resident = lambda shape: pl.BlockSpec(shape, lambda i: (0, 0))  # stays in VMEM

    out = pl.pallas_call(
        mlp_kernel,
        out_shape=jax.ShapeDtypeStruct((Bp, OUT_PAD), jnp.float32),
        grid=(n_tiles,),
        in_specs=[
            pl.BlockSpec((tb, K_PAD), lambda i: (i, 0)),           # x: pipelined per tile
            resident(w1p.shape), resident(b1r.shape),
            resident(w2p.shape), resident(b2r.shape),
            resident(w3p.shape), resident(b3r.shape),
        ],
        out_specs=pl.BlockSpec((tb, OUT_PAD), lambda i: (i, 0)),    # lane-dense output block
        compiler_params=pltpu.CompilerParams(
            dimension_semantics=("parallel",),                      # megacore on v7x
        ),
    )(x, w1p, b1r, w2p, b2r, w3p, b3r)

    return out[:B, :OUT_SIZE]


def init_params(key):
    """Deterministic init mimicking PyTorch nn.Linear default (U[-1/sqrt(fan_in), +])."""
    def linear(k, out_f, in_f):
        kw, kb = jax.random.split(k)
        bound = 1.0 / jnp.sqrt(jnp.float32(in_f))
        w = jax.random.uniform(kw, (out_f, in_f), jnp.float32, -bound, bound)
        b = jax.random.uniform(kb, (out_f,), jnp.float32, -bound, bound)
        return w, b

    k1, k2, k3 = jax.random.split(key, 3)
    w1, b1 = linear(k1, HID_SIZE, IN_SIZE)
    w2, b2 = linear(k2, HID_SIZE, HID_SIZE)
    w3, b3 = linear(k3, OUT_SIZE, HID_SIZE)
    return (w1, b1, w2, b2, w3, b3)


def reference_forward(x_nchw, params):
    """Pure-JAX f32 reference matching the PyTorch forward."""
    w1, b1, w2, b2, w3, b3 = params
    x = x_nchw.reshape(x_nchw.shape[0], -1).astype(jnp.float32)
    h1 = jnp.maximum(x @ w1.T + b1, 0.0)
    h2 = jnp.maximum(h1 @ w2.T + b2, 0.0)
    logits = h2 @ w3.T + b3
    return jax.nn.softmax(logits, axis=-1)


if __name__ == "__main__":
    key = jax.random.PRNGKey(0)
    k_params, k_x1, k_x2 = jax.random.split(key, 3)

    params = init_params(k_params)
    prepared = prepare_params(params)   # one-time transpose/pad/bf16 (outside per-call path)

    # Small MNIST-shaped batch (single grid step, tile clamped to 8 rows).
    x_small = jax.random.uniform(k_x1, (8, 1, 28, 28), jnp.float32)
    out_small = jax.block_until_ready(mlp_classifier_forward(x_small, prepared))
    ref_small = reference_forward(x_small, params)
    assert out_small.shape == (8, OUT_SIZE)
    assert jnp.allclose(out_small, ref_small, atol=3e-2, rtol=3e-2), "small-batch mismatch"
    assert jnp.allclose(jnp.sum(out_small, axis=-1), 1.0, atol=1e-2), "rows must sum to ~1"

    # Larger ragged batch to exercise multi-step grid + batch padding (300 -> 2 tiles of 256).
    x_big = jax.random.uniform(k_x2, (300, 1, 28, 28), jnp.float32)
    out_big = jax.block_until_ready(mlp_classifier_forward(x_big, prepared))
    ref_big = reference_forward(x_big, params)
    assert out_big.shape == (300, OUT_SIZE)
    assert jnp.allclose(out_big, ref_big, atol=3e-2, rtol=3e-2), "big-batch mismatch"
    assert jnp.allclose(jnp.sum(out_big, axis=-1), 1.0, atol=1e-2), "rows must sum to ~1"

    print("KERNEL_OK")
</pallas_src>

<mosaic_0001>
module attributes {stable_mosaic.version = 11 : i64} {
  func.func @mlp_kernel(%arg0: i32, %arg1: memref<8x896xbf16, #tpu.memory_space<vmem>>, %arg2: memref<896x128xbf16, #tpu.memory_space<vmem>>, %arg3: memref<1x128xf32, #tpu.memory_space<vmem>>, %arg4: memref<128x128xbf16, #tpu.memory_space<vmem>>, %arg5: memref<1x128xf32, #tpu.memory_space<vmem>>, %arg6: memref<128x128xbf16, #tpu.memory_space<vmem>>, %arg7: memref<1x128xf32, #tpu.memory_space<vmem>>, %arg8: memref<8x128xf32, #tpu.memory_space<vmem>>) attributes {dimension_semantics = [#tpu.dimension_semantics<parallel>], iteration_bounds = array<i64: 1>, scalar_prefetch = 0 : i64, scratch_operands = 0 : i64, tpu.core_type = #tpu.core_type<tc>, window_params = [{transform_indices = @transform_0, window_bounds = array<i64: 8, 896>}, {pipeline_mode = #tpu.pipeline_mode<synchronous>, transform_indices = @transform_1, window_bounds = array<i64: 896, 128>}, {pipeline_mode = #tpu.pipeline_mode<synchronous>, transform_indices = @transform_2, window_bounds = array<i64: 1, 128>}, {pipeline_mode = #tpu.pipeline_mode<synchronous>, transform_indices = @transform_3, window_bounds = array<i64: 128, 128>}, {pipeline_mode = #tpu.pipeline_mode<synchronous>, transform_indices = @transform_4, window_bounds = array<i64: 1, 128>}, {pipeline_mode = #tpu.pipeline_mode<synchronous>, transform_indices = @transform_5, window_bounds = array<i64: 128, 128>}, {pipeline_mode = #tpu.pipeline_mode<synchronous>, transform_indices = @transform_6, window_bounds = array<i64: 1, 128>}, {transform_indices = @transform_7, window_bounds = array<i64: 8, 128>}]} {
    %c0 = arith.constant 0 : index
    %c0_0 = arith.constant 0 : index
    %0 = vector.load %arg1[%c0, %c0_0] : memref<8x896xbf16, #tpu.memory_space<vmem>>, vector<8x896xbf16>
    %c0_1 = arith.constant 0 : index
    %c0_2 = arith.constant 0 : index
    %1 = vector.load %arg2[%c0_1, %c0_2] : memref<896x128xbf16, #tpu.memory_space<vmem>>, vector<896x128xbf16>
    %cst = arith.constant dense<0.000000e+00> : vector<8x128xf32>
    %2 = tpu.matmul %0, %1, %cst {dimension_numbers = #tpu.dot_dimension_numbers<[1], [0], [0], [1], [0, 0, 1, 1], [], []>} : vector<8x896xbf16>, vector<896x128xbf16>, vector<8x128xf32> -> vector<8x128xf32>
    %c0_3 = arith.constant 0 : index
    %c0_4 = arith.constant 0 : index
    %3 = vector.load %arg3[%c0_3, %c0_4] : memref<1x128xf32, #tpu.memory_space<vmem>>, vector<1x128xf32>
    %4 = vector.broadcast %3 : vector<1x128xf32> to vector<8x128xf32>
    %5 = arith.addf %2, %4 : vector<8x128xf32>
    %cst_5 = arith.constant 0.000000e+00 : f32
    %6 = vector.broadcast %cst_5 : f32 to vector<8x128xf32>
    %7 = arith.maximumf %5, %6 : vector<8x128xf32>
    %8 = arith.truncf %7 : vector<8x128xf32> to vector<8x128xbf16>
    %c0_6 = arith.constant 0 : index
    %c0_7 = arith.constant 0 : index
    %9 = vector.load %arg4[%c0_6, %c0_7] : memref<128x128xbf16, #tpu.memory_space<vmem>>, vector<128x128xbf16>
    %cst_8 = arith.constant dense<0.000000e+00> : vector<8x128xf32>
    %10 = tpu.matmul %8, %9, %cst_8 {dimension_numbers = #tpu.dot_dimension_numbers<[1], [0], [0], [1], [0, 0, 1, 1], [], []>} : vector<8x128xbf16>, vector<128x128xbf16>, vector<8x128xf32> -> vector<8x128xf32>
    %c0_9 = arith.constant 0 : index
    %c0_10 = arith.constant 0 : index
    %11 = vector.load %arg5[%c0_9, %c0_10] : memref<1x128xf32, #tpu.memory_space<vmem>>, vector<1x128xf32>
    %12 = vector.broadcast %11 : vector<1x128xf32> to vector<8x128xf32>
    %13 = arith.addf %10, %12 : vector<8x128xf32>
    %cst_11 = arith.constant 0.000000e+00 : f32
    %14 = vector.broadcast %cst_11 : f32 to vector<8x128xf32>
    %15 = arith.maximumf %13, %14 : vector<8x128xf32>
    %16 = arith.truncf %15 : vector<8x128xf32> to vector<8x128xbf16>
    %c0_12 = arith.constant 0 : index
    %c0_13 = arith.constant 0 : index
    %17 = vector.load %arg6[%c0_12, %c0_13] : memref<128x128xbf16, #tpu.memory_space<vmem>>, vector<128x128xbf16>
    %cst_14 = arith.constant dense<0.000000e+00> : vector<8x128xf32>
    %18 = tpu.matmul %16, %17, %cst_14 {dimension_numbers = #tpu.dot_dimension_numbers<[1], [0], [0], [1], [0, 0, 1, 1], [], []>} : vector<8x128xbf16>, vector<128x128xbf16>, vector<8x128xf32> -> vector<8x128xf32>
    %c0_15 = arith.constant 0 : index
    %c0_16 = arith.constant 0 : index
    %19 = vector.load %arg7[%c0_15, %c0_16] : memref<1x128xf32, #tpu.memory_space<vmem>>, vector<1x128xf32>
    %20 = vector.broadcast %19 : vector<1x128xf32> to vector<8x128xf32>
    %21 = arith.addf %18, %20 : vector<8x128xf32>
    %22 = tpu.iota {dimensions = array<i32: 1>} : vector<8x128xi32>
    %c10_i32 = arith.constant 10 : i32
    %23 = vector.broadcast %c10_i32 : i32 to vector<8x128xi32>
    %24 = arith.cmpi slt, %22, %23 : vector<8x128xi32>
    %cst_17 = arith.constant -1.000000e+30 : f32
    %25 = vector.broadcast %cst_17 : f32 to vector<8x128xf32>
    %26 = arith.select %24, %21, %25 : vector<8x128xi1>, vector<8x128xf32>
    %cst_18 = arith.constant dense<0xFF800000> : vector<8xf32>
    %27 = vector.multi_reduction <maximumf>, %26, %cst_18 [1] : vector<8x128xf32> to vector<8xf32>
    %28 = vector.shape_cast %27 : vector<8xf32> to vector<8x1xf32>
    %29 = vector.broadcast %28 : vector<8x1xf32> to vector<8x128xf32>
    %30 = arith.subf %26, %29 : vector<8x128xf32>
    %31 = math.exp %30 : vector<8x128xf32>
    %cst_19 = arith.constant dense<0.000000e+00> : vector<8xf32>
    %32 = vector.multi_reduction <add>, %31, %cst_19 [1] : vector<8x128xf32> to vector<8xf32>
    %33 = vector.shape_cast %32 : vector<8xf32> to vector<8x1xf32>
    %34 = tpu.reciprocal %33 {approx = true} : vector<8x1xf32> -> vector<8x1xf32>
    %35 = vector.broadcast %34 : vector<8x1xf32> to vector<8x128xf32>
    %36 = arith.mulf %31, %35 : vector<8x128xf32>
    %c0_20 = arith.constant 0 : index
    %c0_21 = arith.constant 0 : index
    %37 = vector.load %arg8[%c0_20, %c0_21] : memref<8x128xf32, #tpu.memory_space<vmem>>, vector<8x128xf32>
    tpu.vector_store %arg8[%c0_20, %c0_21], %36 {strides = array<i32>} : memref<8x128xf32, #tpu.memory_space<vmem>>, vector<8x128xf32>,
    return
  }
  func.func @transform_0(%arg0: i32) -> (i32, i32) {
    %c0_i32 = arith.constant 0 : i32
    %c0_i32_0 = arith.constant 0 : i32
    return %arg0, %c0_i32 : i32, i32
  }
  func.func @transform_1(%arg0: i32) -> (i32, i32) {
    %c0_i32 = arith.constant 0 : i32
    %c0_i32_0 = arith.constant 0 : i32
    %c0_i32_1 = arith.constant 0 : i32
    return %c0_i32, %c0_i32_0 : i32, i32
  }
  func.func @transform_2(%arg0: i32) -> (i32, i32) {
    %c0_i32 = arith.constant 0 : i32
    %c0_i32_0 = arith.constant 0 : i32
    %c0_i32_1 = arith.constant 0 : i32
    return %c0_i32, %c0_i32_0 : i32, i32
  }
  func.func @transform_3(%arg0: i32) -> (i32, i32) {
    %c0_i32 = arith.constant 0 : i32
    %c0_i32_0 = arith.constant 0 : i32
    %c0_i32_1 = arith.constant 0 : i32
    return %c0_i32, %c0_i32_0 : i32, i32
  }
  func.func @transform_4(%arg0: i32) -> (i32, i32) {
    %c0_i32 = arith.constant 0 : i32
    %c0_i32_0 = arith.constant 0 : i32
    %c0_i32_1 = arith.constant 0 : i32
    return %c0_i32, %c0_i32_0 : i32, i32
  }
  func.func @transform_5(%arg0: i32) -> (i32, i32) {
    %c0_i32 = arith.constant 0 : i32
    %c0_i32_0 = arith.constant 0 : i32
    %c0_i32_1 = arith.constant 0 : i32
    return %c0_i32, %c0_i32_0 : i32, i32
  }
  func.func @transform_6(%arg0: i32) -> (i32, i32) {
    %c0_i32 = arith.constant 0 : i32
    %c0_i32_0 = arith.constant 0 : i32
    %c0_i32_1 = arith.constant 0 : i32
    return %c0_i32, %c0_i32_0 : i32, i32
  }
  func.func @transform_7(%arg0: i32) -> (i32, i32) {
    %c0_i32 = arith.constant 0 : i32
    %c0_i32_0 = arith.constant 0 : i32
    return %arg0, %c0_i32 : i32, i32
  }
}

</mosaic_0001>

<bundles_post_ra>
// kernel: tpu_custom_call.1
= control target key start
LH: loop header
LB: loop body
LE: loop exit
PB: predicated region body
PF: predicated region fallthrough
CT: control target
= control target key end

     0   :  { %12 = vsyncpa [#allocation3], 0  ;;  %s1529_s0 = inlined_call_operand.hbm [shape: bf16[8,896], index: 0, kind: input, shape index: {}]   ;;  %s1530_s1 = inlined_call_operand.hbm [shape: bf16[896,128], index: 1, kind: input, shape index: {}]   ;;  %s1531_s2 = inlined_call_operand.vmem [shape: f32[1,128], index: 2, kind: input, shape index: {}]   ;;  %s1532_s3 = inlined_call_operand.hbm [shape: bf16[128,128], index: 3, kind: input, shape index: {}]   ;;  %s1533_s4 = inlined_call_operand.vmem [shape: f32[1,128], index: 4, kind: input, shape index: {}]   ;;  %s1534_s5 = inlined_call_operand.hbm [shape: bf16[128,128], index: 5, kind: input, shape index: {}]   ;;  %s1535_s6 = inlined_call_operand.vmem [shape: f32[1,128], index: 6, kind: input, shape index: {}]   ;;  %s1536_s7 = inlined_call_operand.hbm [shape: f32[8,128], index: 7, kind: output, shape index: {}]  }
   0x1   :  { %13 = vsyncpa [#allocation6], 0 }
   0x2   :  { %14 = vsyncpa [#allocation9], 0 }
   0x3   :  { %15 = vsyncpa [#allocation4], 0  ;;  %s1417_s24 = smov [#allocation5]  }
   0x4   :  { %s31_s25 = sshll.u32 %s1417_s24, 4  ;;  %s32_s25 = int_to_ptr.vmem [resolvable:$true] %s31_s25 }
   0x5   :  { %s1317_s26 = scalar_lea.vmem %s32_s25, 7168  ;;  %p1322_p1 = scmp.lt.s32.totalorder %s32_s25, %s32_s25 }
   0x6   :  { %p1318_p0 = scmp.ne.s32.totalorder %s32_s25, %s1317_s26  ;;  %p1323_p2 = scmp.lt.s32.totalorder %s1317_s26, %s1317_s26 }
   0x8   :  { %p1324_p3 = por %p1323_p2, %p1322_p1 }
   0xa   :  { %p1325_p4 = pnand %p1324_p3, %p1318_p0 }
   0xc   :  { %1328 = shalt.err (!%p1325_p4)
}
   0xd   :  { %s1418_s27 = smov 64   ;;  %s1419_s28 = smov 4  }
   0xe   :  { %37 = dma.hbm_to_vmem [thread:$0]  %s1530_s1, 7168, %s32_s25, [#allocation6], %s1418_s27, %s1418_s27, %s1419_s28  }
   0xf   :  { %s1420_s8 = smov [#allocation2]   ;;  %s1421_s10 = smov [#allocation7]  }
  0x10   :  { %s22_s9 = sshll.u32 %s1420_s8, 4  ;;  %s45_s11 = sshll.u32 %s1421_s10, 4  ;;  %s23_s9 = int_to_ptr.vmem [resolvable:$true] %s22_s9  ;;  %s46_s11 = int_to_ptr.vmem [resolvable:$true] %s45_s11 }
  0x11   :  { %s1337_s12 = scalar_lea.vmem %s23_s9, 448  ;;  %p1342_p6 = scmp.lt.s32.totalorder %s23_s9, %s23_s9 }
  0x12   :  { %p1338_p5 = scmp.ne.s32.totalorder %s23_s9, %s1337_s12  ;;  %p1343_p7 = scmp.lt.s32.totalorder %s1337_s12, %s1337_s12 }
  0x14   :  { %p1344_p8 = por %p1343_p7, %p1342_p6 }
  0x16   :  { %p1345_p9 = pnand %p1344_p8, %p1338_p5 }
  0x18   :  { %1348 = shalt.err (!%p1345_p9)
}
  0x19   :  { %25 = dma.hbm_to_vmem [thread:$0]  %s1529_s0, 448, %s23_s9, [#allocation3]  }
  0x1a   :  { %s1357_s15 = scalar_lea.vmem %s46_s11, 1024  ;;  %p1362_p11 = scmp.lt.s32.totalorder %s46_s11, %s46_s11 }
  0x1b   :  { %p1358_p10 = scmp.ne.s32.totalorder %s46_s11, %s1357_s15  ;;  %p1363_p12 = scmp.lt.s32.totalorder %s1357_s15, %s1357_s15 }
  0x1d   :  { %p1364_p13 = por %p1363_p12, %p1362_p11 }
  0x1f   :  { %p1365_p0 = pnand %p1364_p13, %p1358_p10 }
  0x21   :  { %1368 = shalt.err (!%p1365_p0)
}
  0x22   :  { %51 = dma.hbm_to_vmem [thread:$0]  %s1532_s3, 1024, %s46_s11, [#allocation6], %s1418_s27, %s1418_s27, %s1419_s28  }
  0x23   :  { %s1422_s17 = smov [#allocation8]  }
  0x24   :  { %s59_s18 = sshll.u32 %s1422_s17, 4  ;;  %s60_s18 = int_to_ptr.vmem [resolvable:$true] %s59_s18 }
  0x25   :  { %s1377_s19 = scalar_lea.vmem %s60_s18, 1024  ;;  %p1382_p2 = scmp.lt.s32.totalorder %s60_s18, %s60_s18 }
  0x26   :  { %p1378_p1 = scmp.ne.s32.totalorder %s60_s18, %s1377_s19  ;;  %p1383_p3 = scmp.lt.s32.totalorder %s1377_s19, %s1377_s19 }
  0x28   :  { %p1384_p4 = por %p1383_p3, %p1382_p2 }
  0x2a   :  { %p1385_p5 = pnand %p1384_p4, %p1378_p1 }
  0x2c   :  { %1388 = shalt.err (!%p1385_p5)
}
  0x2d   :  { %65 = dma.hbm_to_vmem [thread:$0]  %s1534_s5, 1024, %s60_s18, [#allocation9], %s1418_s27, %s1418_s27, %s1419_s28  }
  0x2e   :  { %1409 = dma.done.wait [#allocation3], 448  }
  0x2f   :  { %1410 = vsyncadd [#allocation3], 4294966848 }
  0x30   :  { %1411 = dma.done.wait [#allocation6], 8192  }
  0x31   :  { %1412 = vsyncadd [#allocation6], 4294959104 }
  0x32   :  { %1413 = dma.done.wait [#allocation9], 1024  }
  0x33   :  { %1414 = vsyncadd [#allocation9], 4294966272  ;;  %v1226_v0 = vld [vmem:[#allocation5 + $0x78] sm:$0xff]   ;;  %v1230_v4 = vld [vmem:[#allocation5 + $0x70] sm:$0xff]   ;;  %v1423_v39 = vmov 0.0   ;;  %vm1424_vm0 = vmmov 0  }
  0x34   :  { %v1227_v1 = vld [vmem:[#allocation5 + $0xf8] sm:$0xff]   ;;  %1064 = vmatprep.subr.bf16.mxu0 %v1226_v0  ;;  %v1231_v5 = vld [vmem:[#allocation5 + $0xf0] sm:$0xff]   ;;  %v1234_v8 = vld [vmem:[#allocation5 + $0x68] sm:$0xff]  }
  0x35   :  { %v1228_v2 = vld [vmem:[#allocation5 + $0x38] sm:$0xff]   ;;  %1086 = vmatprep.subr.bf16.mxu1 %v1227_v1  ;;  %v1232_v6 = vld [vmem:[#allocation5 + $0x30] sm:$0xff]   ;;  %v1235_v9 = vld [vmem:[#allocation5 + $0xe8] sm:$0xff]  }
  0x36   :  { %v1229_v3 = vld [vmem:[#allocation5 + $0xb8] sm:$0xff]   ;;  %1065 = vmatpush3.bf16.msra.mxu0 %v1228_v2  ;;  %v1233_v7 = vld [vmem:[#allocation5 + $0xb0] sm:$0xff]   ;;  %v1236_v10 = vld [vmem:[#allocation5 + $0x28] sm:$0xff]  }
  0x37   :  { %1087 = vmatpush3.bf16.msra.mxu1 %v1229_v3  ;;  %1066 = vmatprep.subr.bf16.mxu0 %v1230_v4  ;;  %v1237_v11 = vld [vmem:[#allocation5 + $0xa8] sm:$0xff]   ;;  %v1238_v12 = vld [vmem:[#allocation5 + $0x60] sm:$0xff]   ;;  %v1242_v16 = vld [vmem:[#allocation5 + $0x58] sm:$0xff]  }
  0x38   :  { %1088 = vmatprep.subr.bf16.mxu1 %v1231_v5  ;;  %v1239_v13 = vld [vmem:[#allocation5 + $0xe0] sm:$0xff]   ;;  %v1243_v17 = vld [vmem:[#allocation5 + $0xd8] sm:$0xff]   ;;  %v1246_v20 = vld [vmem:[#allocation5 + $0x50] sm:$0xff]  }
  0x39   :  { %v1240_v14 = vld [vmem:[#allocation5 + $0x20] sm:$0xff]   ;;  %v1244_v18 = vld [vmem:[#allocation5 + $0x18] sm:$0xff]   ;;  %v1247_v21 = vld [vmem:[#allocation5 + $0xd0] sm:$0xff]  }
  0x3a   :  { %1067 = vmatpush3.bf16.msra.mxu0 %v1232_v6  ;;  %v1241_v15 = vld [vmem:[#allocation5 + $0xa0] sm:$0xff]   ;;  %v1245_v19 = vld [vmem:[#allocation5 + $0x98] sm:$0xff]   ;;  %v1248_v22 = vld [vmem:[#allocation5 + $0x10] sm:$0xff]  }
  0x3b   :  { %1089 = vmatpush3.bf16.msra.mxu1 %v1233_v7  ;;  %1068 = vmatprep.subr.bf16.mxu0 %v1234_v8  ;;  %v1249_v23 = vld [vmem:[#allocation5 + $0x90] sm:$0xff]   ;;  %v1250_v24 = vld [vmem:[#allocation5 + $0x48] sm:$0xff]   ;;  %v1254_v28 = vld [vmem:[#allocation5 + $0x40] sm:$0xff]  }
  0x3c   :  { %1090 = vmatprep.subr.bf16.mxu1 %v1235_v9  ;;  %v1251_v25 = vld [vmem:[#allocation5 + $0xc8] sm:$0xff]   ;;  %v1255_v29 = vld [vmem:[#allocation5 + $0xc0] sm:$0xff]   ;;  %v1262_v38 = vld [vmem:[#allocation5 + $0x178] sm:$0xff]  }
  0x3d   :  { %v1252_v26 = vld [vmem:[#allocation5 + $0x8] sm:$0xff]   ;;  %v1256_v30 = vld [vmem:[#allocation5] sm:$0xff]   ;;  %v1263_v40 = vld [vmem:[#allocation5 + $0x138] sm:$0xff]  }
  0x3e   :  { %1069 = vmatpush3.bf16.msra.mxu0 %v1236_v10  ;;  %v1253_v27 = vld [vmem:[#allocation5 + $0x88] sm:$0xff]   ;;  %v1257_v31 = vld [vmem:[#allocation5 + $0x80] sm:$0xff]   ;;  %v1264_v41 = vld [vmem:[#allocation5 + $0x1b8] sm:$0xff]  }
  0x3f   :  { %1091 = vmatpush3.bf16.msra.mxu1 %v1237_v11  ;;  %1070 = vmatprep.subr.bf16.mxu0 %v1238_v12  ;;  %v81_v32 = vld [vmem:[#allocation2] sm:$0xff]  ;;  %v82_v33 = vld [vmem:[#allocation2 + $0x8] sm:$0xff]  ;;  %v1274_v51 = vld [vmem:[#allocation5 + $0x158] sm:$0xff]  }
  0x40   :  { %1092 = vmatprep.subr.bf16.mxu1 %v1239_v13  ;;  %v983_v34 = vcombine.low %v81_v32, %v81_v32  ;;  %v984_v35 = vcombine.high %v81_v32, %v81_v32  ;;  %v985_v36 = vcombine.low %v82_v33, %v82_v33  ;;  %v986_v37 = vcombine.high %v82_v33, %v82_v33  ;;  %v1265_v42 = vld [vmem:[#allocation5 + $0x170] sm:$0xff]   ;;  %v1268_v45 = vld [vmem:[#allocation5 + $0x168] sm:$0xff]   ;;  %v1271_v48 = vld [vmem:[#allocation5 + $0x160] sm:$0xff]  }
  0x41   :  { %v1266_v43 = vld [vmem:[#allocation5 + $0x130] sm:$0xff]   ;;  %v1269_v46 = vld [vmem:[#allocation5 + $0x128] sm:$0xff]   ;;  %v1272_v49 = vld [vmem:[#allocation5 + $0x120] sm:$0xff]  }
  0x42   :  { %1071 = vmatpush3.bf16.msra.mxu0 %v1240_v14  ;;  %597 = vmatprep.mubr.bf16.mxu0 %v984_v35  ;;  %v1267_v44 = vld [vmem:[#allocation5 + $0x1b0] sm:$0xff]   ;;  %v1270_v47 = vld [vmem:[#allocation5 + $0x1a8] sm:$0xff]   ;;  %v1273_v50 = vld [vmem:[#allocation5 + $0x1a0] sm:$0xff]  }
  0x43   :  { %1093 = vmatpush3.bf16.msra.mxu1 %v1241_v15  ;;  %1072 = vmatprep.subr.bf16.mxu0 %v1242_v16  ;;  %v1275_v52 = vld [vmem:[#allocation5 + $0x118] sm:$0xff]   ;;  %v1277_v54 = vld [vmem:[#allocation5 + $0x150] sm:$0xff]   ;;  %v1280_v57 = vld [vmem:[#allocation5 + $0x148] sm:$0xff]  }
  0x44   :  { %1094 = vmatprep.subr.bf16.mxu1 %v1243_v17  ;;  %637 = vmatprep.mubr.bf16.mxu1 %v986_v37  ;;  %v1276_v53 = vld [vmem:[#allocation5 + $0x198] sm:$0xff]   ;;  %v1278_v55 = vld [vmem:[#allocation5 + $0x110] sm:$0xff]   ;;  %v1281_v58 = vld [vmem:[#allocation5 + $0x108] sm:$0xff]  }
  0x45   :  { %v1279_v56 = vld [vmem:[#allocation5 + $0x190] sm:$0xff]   ;;  %v1282_v59 = vld [vmem:[#allocation5 + $0x188] sm:$0xff]   ;;  %v1283_v61 = vld [vmem:[#allocation5 + $0x140] sm:$0xff]  }
  0x46   :  { %1073 = vmatpush3.bf16.msra.mxu0 %v1244_v18  ;;  %v83_v60 = vld [vmem:[#allocation2 + $0x10] sm:$0xff]  ;;  %v1284_v63 = vld [vmem:[#allocation5 + $0x100] sm:$0xff]   ;;  %v1288_v1 = vld [vmem:[#allocation2 + $0x18] ss:$0 sps:$4 sm:$0xff]  }
  0x47   :  { %1095 = vmatpush3.bf16.msra.mxu1 %v1245_v19  ;;  %1074 = vmatprep.subr.bf16.mxu0 %v1246_v20  ;;  %v988_v62 = vcombine.high %v83_v60, %v83_v60  ;;  %v1285_v0 = vld [vmem:[#allocation5 + $0x180] sm:$0xff]   ;;  %v987_v2 = vcombine.low %v83_v60, %v83_v60  ;;  %v1289_v3 = vld [vmem:[#allocation7 + $0x38] sm:$0xff]   ;;  %v1290_v4 = vld [vmem:[#allocation7 + $0x30] sm:$0xff]  }
  0x48   :  { %1096 = vmatprep.subr.bf16.mxu1 %v1247_v21  ;;  %v1291_v5 = vld [vmem:[#allocation7 + $0x28] sm:$0xff]   ;;  %v1292_v6 = vld [vmem:[#allocation7 + $0x20] sm:$0xff]   ;;  %v1293_v7 = vld [vmem:[#allocation7 + $0x18] sm:$0xff]  }
  0x49   :  { %v1294_v8 = vld [vmem:[#allocation7 + $0x10] sm:$0xff]   ;;  %v1295_v9 = vld [vmem:[#allocation7 + $0x8] sm:$0xff]   ;;  %v1296_v10 = vld [vmem:[#allocation7] sm:$0xff]  }
  0x4a   :  { %1075 = vmatpush3.bf16.msra.mxu0 %v1248_v22  ;;  %v1297_v11 = vld [vmem:[#allocation8 + $0x38] sm:$0xff]   ;;  %v1298_v12 = vld [vmem:[#allocation8 + $0x30] sm:$0xff]   ;;  %v1299_v13 = vld [vmem:[#allocation8 + $0x28] sm:$0xff]  }
  0x4b   :  { %1097 = vmatpush3.bf16.msra.mxu1 %v1249_v23  ;;  %1076 = vmatprep.subr.bf16.mxu0 %v1250_v24  ;;  %v1300_v14 = vld [vmem:[#allocation8 + $0x20] sm:$0xff]   ;;  %v1301_v15 = vld [vmem:[#allocation8 + $0x18] sm:$0xff]   ;;  %v1302_v16 = vld [vmem:[#allocation8 + $0x10] sm:$0xff]  }
  0x4c   :  { %1098 = vmatprep.subr.bf16.mxu1 %v1251_v25 }
  0x4e   :  { %1077 = vmatpush3.bf16.msra.mxu0 %v1252_v26  ;;  %v982_v26 = vld [vmem:[%s1531_s2] ss:$0 sm:$0xff] }
  0x4f   :  { %1099 = vmatpush3.bf16.msra.mxu1 %v1253_v27  ;;  %1078 = vmatprep.subr.bf16.mxu0 %v1254_v28 }
  0x50   :  { %1100 = vmatprep.subr.bf16.mxu1 %v1255_v29 }
  0x52   :  { %1079 = vmatpush3.bf16.msra.mxu0 %v1256_v30 }
  0x53   :  { %1101 = vmatpush3.bf16.msra.mxu1 %v1257_v31  ;;  %1108 = vmatprep.subr.bf16.mxu0 %v1262_v38 }
  0x54   :  { %1157 = vmatprep.subr.bf16.mxu1 %v1423_v39 }
  0x55   :  { %598 = vmatmul.mubr.bf16.vlgmr.msra.gmra.mxu0 %v983_v34 }
  0x56   :  { %638 = vmatmul.mubr.bf16.vlgmr.msra.gmra.mxu1 %v985_v36  ;;  %1109 = vmatpush3.bf16.msra.mxu0 %v1263_v40 }
  0x57   :  { %1158 = vmatpush3.bf16.msra.mxu1 %v1264_v41  ;;  %1110 = vmatprep.subr.bf16.mxu0 %v1265_v42 }
  0x58   :  { %1159 = vmatprep.subr.bf16.mxu1 %v1423_v39  ;;  %1173 = vmatprep.mubr.msk.bf16.mxu1 %vm1424_vm0, %v1423_v39 }
  0x59   :  { %677 = vmatprep.mubr.bf16.mxu0 %v988_v62 }
  0x5a   :  { %1111 = vmatpush3.bf16.msra.mxu0 %v1266_v43 }
  0x5b   :  { %1160 = vmatpush3.bf16.msra.mxu1 %v1267_v44  ;;  %1112 = vmatprep.subr.bf16.mxu0 %v1268_v45  ;;  %v1303_v44 = vld [vmem:[#allocation8 + $0x8] sm:$0xff]   ;;  %v1304_v45 = vld [vmem:[#allocation8] sm:$0xff]  }
  0x5c   :  { %1161 = vmatprep.subr.bf16.mxu1 %v1423_v39 }
  0x5e   :  { %1113 = vmatpush3.bf16.msra.mxu0 %v1269_v46  ;;  %v1046_v46 = vld [vmem:[%s1533_s4] ss:$0 sm:$0xff]  ;;  %s1425_s4 = smov [#allocation10]  }
  0x5f   :  { %1162 = vmatpush3.bf16.msra.mxu1 %v1270_v47  ;;  %1114 = vmatprep.subr.bf16.mxu0 %v1271_v48  ;;  %s971_s24 = sshll.u32 %s1425_s4, 4  ;;  %s972_s24 = int_to_ptr.vmem [resolvable:$true] %s971_s24 }
  0x60   :  { %1163 = vmatprep.subr.bf16.mxu1 %v1423_v39  ;;  %p1394_p7 = scmp.lt.s32.totalorder %s972_s24, %s972_s24 }
  0x62   :  { %1115 = vmatpush3.bf16.msra.mxu0 %v1272_v49 }
  0x63   :  { %1164 = vmatpush3.bf16.msra.mxu1 %v1273_v50  ;;  %1116 = vmatprep.subr.bf16.mxu0 %v1274_v51 }
  0x64   :  { %1165 = vmatprep.subr.bf16.mxu1 %v1423_v39 }
  0x66   :  { %1117 = vmatpush3.bf16.msra.mxu0 %v1275_v52 }
  0x67   :  { %1166 = vmatpush3.bf16.msra.mxu1 %v1276_v53  ;;  %1118 = vmatprep.subr.bf16.mxu0 %v1277_v54  ;;  %v951_v54 = vlaneseq }
  0x68   :  { %1167 = vmatprep.subr.bf16.mxu1 %v1423_v39 }
  0x6a   :  { %1119 = vmatpush3.bf16.msra.mxu0 %v1278_v55  ;;  %v952_v55 = vand.u32 127, %v951_v54 }
  0x6b   :  { %1168 = vmatpush3.bf16.msra.mxu1 %v1279_v56  ;;  %1120 = vmatprep.subr.bf16.mxu0 %v1280_v57 }
  0x6c   :  { %1169 = vmatprep.subr.bf16.mxu1 %v1423_v39  ;;  %vm953_vm1 = vcmp.lt.s32.totalorder %v952_v55, 10 }
  0x6e   :  { %1121 = vmatpush3.bf16.msra.mxu0 %v1281_v58 }
  0x6f   :  { %1170 = vmatpush3.bf16.msra.mxu1 %v1282_v59  ;;  %1122 = vmatprep.subr.bf16.mxu0 %v1283_v61 }
  0x70   :  { %1171 = vmatprep.subr.bf16.mxu1 %v1423_v39 }
  0x72   :  { %1123 = vmatpush3.bf16.msra.mxu0 %v1284_v63 }
  0x73   :  { %1172 = vmatpush3.bf16.msra.mxu1 %v1285_v0  ;;  %1177 = vmatprep.subr.bf16.mxu0 %v1423_v39 }
  0x74   :  { %1197 = vmatprep.subr.bf16.mxu1 %v1423_v39 }
  0x75   :  { %678 = vmatmul.mubr.bf16.vlgmr.msra.gmra.mxu0 %v987_v2 }
  0x76   :  { %1174 = vmatmul.mubr.bf16.vlgmr.msra.gmra.mxu1 %v1288_v1  ;;  %1193 = vmatprep.mubr.msk.bf16.mxu0 %vm1424_vm0, %v1423_v39 }
  0x77   :  { %1213 = vmatprep.mubr.msk.bf16.mxu1 %vm1424_vm0, %v1423_v39  ;;  %1178 = vmatpush3.bf16.msra.mxu0 %v1289_v3 }
  0x78   :  { %1179 = vmatprep.subr.bf16.mxu0 %v1423_v39  ;;  %1198 = vmatpush3.bf16.msra.mxu1 %v1297_v11 }
  0x79   :  { %1199 = vmatprep.subr.bf16.mxu1 %v1423_v39 }
  0x7b   :  { %1180 = vmatpush3.bf16.msra.mxu0 %v1290_v4 }
  0x7c   :  { %1181 = vmatprep.subr.bf16.mxu0 %v1423_v39  ;;  %1200 = vmatpush3.bf16.msra.mxu1 %v1298_v12 }
  0x7d   :  { %1201 = vmatprep.subr.bf16.mxu1 %v1423_v39 }
  0x7f   :  { %1182 = vmatpush3.bf16.msra.mxu0 %v1291_v5 }
  0x80   :  { %1183 = vmatprep.subr.bf16.mxu0 %v1423_v39  ;;  %1202 = vmatpush3.bf16.msra.mxu1 %v1299_v13 }
  0x81   :  { %1203 = vmatprep.subr.bf16.mxu1 %v1423_v39 }
  0x83   :  { %1184 = vmatpush3.bf16.msra.mxu0 %v1292_v6 }
  0x84   :  { %1185 = vmatprep.subr.bf16.mxu0 %v1423_v39  ;;  %1204 = vmatpush3.bf16.msra.mxu1 %v1300_v14 }
  0x85   :  { %1205 = vmatprep.subr.bf16.mxu1 %v1423_v39 }
  0x87   :  { %1186 = vmatpush3.bf16.msra.mxu0 %v1293_v7 }
  0x88   :  { %1187 = vmatprep.subr.bf16.mxu0 %v1423_v39  ;;  %1206 = vmatpush3.bf16.msra.mxu1 %v1301_v15 }
  0x89   :  { %1207 = vmatprep.subr.bf16.mxu1 %v1423_v39 }
  0x8b   :  { %1188 = vmatpush3.bf16.msra.mxu0 %v1294_v8 }
  0x8c   :  { %1189 = vmatprep.subr.bf16.mxu0 %v1423_v39  ;;  %1208 = vmatpush3.bf16.msra.mxu1 %v1302_v16 }
  0x8d   :  { %1209 = vmatprep.subr.bf16.mxu1 %v1423_v39 }
  0x8f   :  { %1190 = vmatpush3.bf16.msra.mxu0 %v1295_v9 }
  0x90   :  { %1191 = vmatprep.subr.bf16.mxu0 %v1423_v39  ;;  %1210 = vmatpush3.bf16.msra.mxu1 %v1303_v44 }
  0x91   :  { %1211 = vmatprep.subr.bf16.mxu1 %v1423_v39  ;;  %v1055_v39 = vld [vmem:[%s1535_s6] ss:$0 sm:$0xff]  ;;  %s1389_s6 = scalar_lea.vmem %s972_s24, 128 }
  0x92   :  { %p1390_p6 = scmp.ne.s32.totalorder %s972_s24, %s1389_s6  ;;  %p1395_p8 = scmp.lt.s32.totalorder %s1389_s6, %s1389_s6 }
  0x93   :  { %1192 = vmatpush3.bf16.msra.mxu0 %v1296_v10 }
  0x94   :  { %1212 = vmatpush3.bf16.msra.mxu1 %v1304_v45  ;;  %p1396_p9 = por %p1395_p8, %p1394_p7 }
  0x96   :  { %p1397_p10 = pnand %p1396_p9, %p1390_p6 }
 0x115   :  { %v1080_v17 = vpop.f32.mrf.mxu0 }
 0x116   :  { %v1102_v18 = vpop.f32.mrf.mxu1 }
 0x117   :  { %v1081_v19 = vpop.f32.mrf.mxu0 }
 0x118   :  { %v1103_v20 = vpop.f32.mrf.mxu1  ;;  %v1082_v25 = vadd.f32 %v1081_v19, %v1080_v17 }
 0x119   :  { %v1083_v21 = vpop.f32.mrf.mxu0  ;;  %v1104_v28 = vadd.f32 %v1103_v20, %v1102_v18 }
 0x11a   :  { %v1105_v22 = vpop.f32.mrf.mxu1  ;;  %v600_v27 = vadd.f32 %v1082_v25, %v982_v26 }
 0x11b   :  { %v1084_v23 = vpop.f32.mrf.mxu0 }
 0x11c   :  { %v1106_v24 = vpop.f32.mrf.mxu1  ;;  %v640_v32 = vadd.f32 %v1104_v28, %v600_v27 }
 0x135   :  { %v1124_v29 = vpop.f32.mrf.mxu0 }
 0x136   :  { %v719_v30 = vpop.f32.mrf.mxu1 }
 0x137   :  { %v1125_v31 = vpop.f32.mrf.mxu0 }
 0x138   :  { %v1126_v33 = vadd.f32 %v1125_v31, %v1124_v29  ;;  %v1175_v34 = vpop.f32.mrf.mxu1 }
 0x139   :  { %v1127_v35 = vpop.f32.mrf.mxu0 }
 0x13a   :  { %v680_v36 = vadd.f32 %v1126_v33, %v640_v32  ;;  %v722_v37 = vpop.f32.mrf.mxu1 }
 0x13b   :  { %v1128_v38 = vpop.f32.mrf.mxu0 }
 0x13c   :  { %v720_v40 = vadd.f32 %v719_v30, %v680_v36  ;;  %v1176_v41 = vpop.f32.mrf.mxu1 }
 0x13e   :  { %v725_v42 = vmax.f32 %v720_v40, 0.0 }
 0x140   :  { %v726_v43 = vpack.c.bf16 %v725_v42, %v725_v42 }
 0x142   :  { %1194 = vmatmul.mubr.bf16.vlgmr.msra.gmra.mxu0 %v726_v43 }
 0x202   :  { %v832_v47 = vpop.f32.mrf.mxu0 }
 0x203   :  { %v833_v48 = vadd.f32 %v1046_v46, %v832_v47 }
 0x204   :  { %v1195_v49 = vpop.f32.mrf.mxu0 }
 0x205   :  { %v838_v50 = vmax.f32 %v833_v48, 0.0 }
 0x206   :  { %v835_v51 = vpop.f32.mrf.mxu0 }
 0x207   :  { %v839_v52 = vpack.c.bf16 %v838_v50, %v838_v50 }
 0x208   :  { %v1196_v53 = vpop.f32.mrf.mxu0 }
 0x209   :  { %1214 = vmatmul.mubr.bf16.vlgmr.msra.gmra.mxu1 %v839_v52 }
 0x2c9   :  { %v945_v56 = vpop.f32.mrf.mxu1 }
 0x2ca   :  { %v946_v57 = vadd.f32 %v1055_v39, %v945_v56 }
 0x2cb   :  { %v1215_v58 = vpop.f32.mrf.mxu1 }
 0x2cc   :  { %v954_v59 = vsel %vm953_vm1, %v946_v57, -1e+30 }
 0x2cd   :  { %955 = vmax.xlane.f32.xlu0 %v954_v59  ;;  %v948_v60 = vpop.f32.mrf.mxu1 }
 0x2cf   :  { %v1216_v61 = vpop.f32.mrf.mxu1 }
 0x356   :  { %v956_v62 = vpop.xlane.xlu0 %955 }
 0x357   :  { %v957_v63 = vsub.f32 %v954_v59, %v956_v62 }
 0x359   :  { %v958_v0 = vmul.f32 1.442695, %v957_v63 }
 0x35b   :  { %1305 = vpow2.f32 %v958_v0 }
 0x368   :  { %v1306_v1 = vpop.eup %1305 }
 0x369   :  { %960 = vadd.xlane.f32.xlu0 %v1306_v1 }
 0x3f2   :  { %v961_v2 = vpop.xlane.xlu0 %960 }
 0x3f3   :  { %1307 = vrcp.f32 %v961_v2 }
 0x400   :  { %v1308_v3 = vpop.eup %1307 }
 0x401   :  { %v963_v4 = vmul.f32 %v1308_v3, %v1306_v1 }
 0x403   :  { %964 = vst [vmem:[#allocation10] sm:$0xff] %v963_v4 }
 0x404   :  { %1400 = shalt.err (!%p1397_p10)
}
 0x405   :  { %974 = dma.vmem_to_hbm [thread:$0]  %s972_s24, 128, %s1536_s7, [#allocation4]  }
 0x406   :  { %1415 = dma.done.wait [#allocation4], 128  }
 0x407   :  { %1416 = vsyncadd [#allocation4], 4294967168 }
 0x408   :  { %978 = vsyncpa [#allocation3], 1 }
 0x409   :  { %979 = vsyncpa [#allocation6], 1 }
 0x40a   :  { %980 = vsyncpa [#allocation9], 1 }
 0x40b   :  { %981 = vsyncpa [#allocation4], 1 }

</bundles_post_ra>
